<compile_context>
chip_gen: v7x
topology: tpu7x:2x2x1
jax: 0.10.0
libtpu: 0.0.40
codegen_flags: <defaults>
</compile_context>

<pallas_src>
import functools

import jax
import jax.numpy as jnp
from jax import lax
from jax.experimental import pallas as pl
from jax.experimental.pallas import tpu as pltpu


def _criterion_sand_kernel(x_ref, g_ref, out_ref,
                           gram_acc, m_acc, l_acc,
                           *, temperature, neg_m, half, n_total, tk,
                           has_tail, mxu_dtype):
    """Fused AND + augmentation loss.  Grid axis streams the feature dim N."""
    k = pl.program_id(0)
    nk = pl.num_programs(0)
    n = x_ref.shape[0]                        # 2B rows (resident)

    @pl.when(k == 0)
    def _init():
        gram_acc[...] = jnp.zeros_like(gram_acc)
        m_acc[...] = jnp.full_like(m_acc, -jnp.inf)
        l_acc[...] = jnp.zeros_like(l_acc)

    x = x_ref[...].astype(jnp.float32)        # (n, tk), upcast in-kernel

    if has_tail:
        # Only needed when N % tk != 0: out-of-range columns of the last tile
        # contain garbage; feed -inf to the softmax path, 0 to the Gram.
        col_ids = k * tk + lax.broadcasted_iota(jnp.int32, x.shape, 1)
        valid = col_ids < n_total
        x_exp = jnp.where(valid, x, -jnp.inf)
        x_gram = jnp.where(valid, x, 0.0)
    else:
        x_exp = x
        x_gram = x

    # ---------------- AND loss: online logsumexp over the bank ---------------
    tile_max = jnp.max(x_exp, axis=1, keepdims=True)
    m_new = jnp.maximum(m_acc[...], tile_max)
    corr = jnp.exp(m_acc[...] - m_new)
    e = jnp.exp(x_exp - m_new)
    l_acc[...] = corr * l_acc[...] + jnp.sum(e, axis=1, keepdims=True)
    m_acc[...] = m_new

    # ---------------- Aug loss: f32 Gram accumulation on the MXU -------------
    # Same contraction pattern as flash-attention's 'qd,kd->qk'; no RHS
    # transpose is materialized by Mosaic for lane-dim contraction.
    xc = x_gram.astype(mxu_dtype)
    gram_acc[...] += lax.dot_general(xc, xc, (((1,), (1,)), ((), ())),
                                     preferred_element_type=jnp.float32)

    # ------------------------------ finalize ---------------------------------
    @pl.when(k == nk - 1)
    def _finalize():
        # AND loss per row = logsumexp(all logits) - logsumexp(gathered logits)
        # gathered slab g: column 0 = label logit, columns 1..K = neighbour
        # logits (-inf for non-anchor rows).  Computed in log-space => no
        # underflow even when the picked logits sit far below the row max.
        g = g_ref[...].astype(jnp.float32)                       # (n, K+1)
        g_max = jnp.max(g, axis=1, keepdims=True)
        g_lse = g_max + jnp.log(jnp.sum(jnp.exp(g - g_max), axis=1,
                                        keepdims=True))
        lse_all = m_acc[...] + jnp.log(l_acc[...])
        and_sum = jnp.sum(lse_all - g_lse, keepdims=True)        # (1, 1)

        # Aug loss: normalize the Gram post-hoc with rsqrt of diag(Gram)
        # (no separate sum-of-squares accumulator needed).
        gram = gram_acc[...]
        row = lax.broadcasted_iota(jnp.int32, (n, n), 0)
        col = lax.broadcasted_iota(jnp.int32, (n, n), 1)
        is_diag = row == col
        ss = jnp.sum(jnp.where(is_diag, gram, 0.0), axis=1, keepdims=True)
        inv_norm = lax.rsqrt(jnp.maximum(ss, 1e-24))             # (n, 1)
        # outer(inv, inv) via a rank-1 matmul (avoids any transpose/relayout)
        scale = lax.dot_general(inv_norm, inv_norm, (((1,), (1,)), ((), ())),
                                preferred_element_type=jnp.float32)
        ap = jnp.exp(gram * scale * (1.0 / temperature))
        ap = jnp.where(is_diag, 0.0, ap)                         # * (1 - eye)
        # positive pair column (i + half) mod n, without an integer modulo
        pos_mask = (col == row + half) | (col == row - half)
        pos = jnp.sum(jnp.where(pos_mask, ap, 0.0), axis=1, keepdims=True)

        row_sum = jnp.sum(ap, axis=1, keepdims=True)
        if neg_m == 1.0:                                         # static branch
            all_div = row_sum
        else:
            all_div = (row_sum - pos) * neg_m + pos

        # per-row reciprocal once, then multiplies (no (n,n) divide).
        inv_div = pl.reciprocal(all_div, approx=False)           # (n, 1)
        lnPmt = pos * inv_div
        ratio = ap * inv_div
        lnPon = (jnp.sum(jnp.log(1.0 - ratio), axis=1, keepdims=True)
                 - jnp.log(1.0 - lnPmt))
        aug_total = (jnp.sum(jnp.log(lnPmt), keepdims=True)
                     + neg_m * jnp.sum(lnPon, keepdims=True))    # (1, 1)

        # total = AND_loss + aug_loss = and_sum/n + (-aug_total/n)
        out_ref[...] = (and_sum - aug_total) * (1.0 / n)


def _pick_tile(n2, N, itemsize, block_k=None):
    """Feature-dim tile: ~2 MiB streamed slab, lane-aligned, cdiv-gridded."""
    if N <= 128:
        return N                                 # single full-width block
    if block_k is not None:
        tk = max(128, (int(block_k) // 128) * 128)
    else:
        target_bytes = 2 * 1024 * 1024           # ~2 MiB per streamed tile
        tk = (target_bytes // (n2 * itemsize)) // 128 * 128
        tk = int(max(512, min(tk, 8192)))
    n_pad = ((N + 127) // 128) * 128
    return int(min(tk, n_pad))


def criterion_sand_forward(x, y, position, neighbours, *, neg_m, temperature,
                           block_k=None, mxu_dtype=jnp.float32):
    """Full Criterion_SAND forward.  x: (2B, N) f32/bf16, y: (B,) int."""
    x = jnp.asarray(x)                           # keep native dtype (bf16 ok)
    n2, N = x.shape
    half = n2 // 2
    K = neighbours.shape[1]

    # Tiny wrapper-side gather (O(B*K)): the (2B, K+1) slab of logits the AND
    # loss needs -- label first, then neighbours (masked to -inf for rows whose
    # memory-bank slot is an instance, not an anchor).
    y = jnp.asarray(y, jnp.int32)
    pos_flag = position[y]                                         # (B,)
    is_anchor = pos_flag >= 0                                      # (B,) bool
    nbr_idx = neighbours[jnp.clip(pos_flag, 0)].astype(jnp.int32)  # (B, K)
    gidx = jnp.concatenate([y[:, None], nbr_idx], axis=1)          # (B, K+1)
    gidx = jnp.concatenate([gidx, gidx], axis=0)                   # (2B, K+1)
    g = jnp.take_along_axis(x, gidx, axis=1).astype(jnp.float32)   # (2B, K+1)
    keep = jnp.concatenate(
        [jnp.ones((n2, 1), jnp.bool_),
         jnp.broadcast_to(jnp.concatenate([is_anchor, is_anchor])[:, None],
                          (n2, K))],
        axis=1)
    g = jnp.where(keep, g, -jnp.inf)

    # Contraction tile + grid: cdiv grid with in-kernel tail masking.
    tk = _pick_tile(n2, N, x.dtype.itemsize, block_k)
    nk = pl.cdiv(N, tk)
    has_tail = (N % tk) != 0

    kernel = functools.partial(
        _criterion_sand_kernel, temperature=float(temperature),
        neg_m=float(neg_m), half=half, n_total=N, tk=tk,
        has_tail=has_tail, mxu_dtype=mxu_dtype)

    out = pl.pallas_call(
        kernel,
        out_shape=jax.ShapeDtypeStruct((1, 1), jnp.float32),
        grid_spec=pltpu.PrefetchScalarGridSpec(
            num_scalar_prefetch=0,
            grid=(nk,),
            in_specs=[
                pl.BlockSpec((n2, tk), lambda k: (0, k)),     # x streamed over N
                pl.BlockSpec((n2, K + 1), lambda k: (0, 0)),  # gathered logits
            ],
            out_specs=pl.BlockSpec((1, 1), lambda k: (0, 0)),
            scratch_shapes=[
                pltpu.VMEM((n2, n2), jnp.float32),   # Gram accumulator
                pltpu.VMEM((n2, 1), jnp.float32),    # running max
                pltpu.VMEM((n2, 1), jnp.float32),    # running sum(exp)
            ]),
        compiler_params=pltpu.CompilerParams(
            dimension_semantics=("arbitrary",),      # reduction over N chunks
            vmem_limit_bytes=32 * 1024 * 1024),      # safe on v5e/v6e/v7x
    )(x, g)
    return out[0, 0]


def reference_forward(x, y, position, neighbours, *, neg_m, temperature):
    """Plain-JAX transcription of the PyTorch forward (eager; for checking)."""
    x = jnp.asarray(x, jnp.float32)
    n2, N = x.shape
    half = n2 // 2
    pos_flag = position[y]
    inst_idx = jnp.nonzero(pos_flag < 0)[0]
    anchor_idx = jnp.nonzero(pos_flag >= 0)[0]

    x1, x2 = x[:half], x[half:]
    preds1 = jax.nn.softmax(x1, axis=1)
    preds2 = jax.nn.softmax(x2, axis=1)

    l_inst = 0.0
    if inst_idx.shape[0] > 0:
        y_inst = y[inst_idx]
        l_inst = (-jnp.log(preds1[inst_idx, y_inst]).sum()
                  - jnp.log(preds2[inst_idx, y_inst]).sum())

    l_ans = 0.0
    if anchor_idx.shape[0] > 0:
        y_ans = y[anchor_idx]
        nbr = neighbours[position[y_ans]]
        p1 = preds1[anchor_idx]
        p2 = preds2[anchor_idx]
        p1n = jnp.take_along_axis(p1, nbr, axis=1).sum(1)
        p2n = jnp.take_along_axis(p2, nbr, axis=1).sum(1)
        ar = jnp.arange(anchor_idx.shape[0])
        l_ans = (-jnp.log(p1[ar, y_ans] + p1n).sum()
                 - jnp.log(p2[ar, y_ans] + p2n).sum())

    and_loss = (l_inst + l_ans) / n2

    xn = x / jnp.linalg.norm(x, axis=1, keepdims=True)
    reordered = jnp.concatenate([xn[half:], xn[:half]], axis=0)
    pos = jnp.exp((xn * reordered).sum(1) / temperature)
    all_prob = jnp.exp(xn @ xn.T / temperature) * (1.0 - jnp.eye(n2))
    if neg_m == 1.0:
        all_div = all_prob.sum(1)
    else:
        all_div = (all_prob.sum(1) - pos) * neg_m + pos
    lnPmt = pos / all_div
    lnPon = jnp.log(1.0 - all_prob / all_div[:, None]).sum(1) - jnp.log(1.0 - lnPmt)
    aug_loss = -(jnp.log(lnPmt).sum() + neg_m * lnPon.sum()) / n2
    return and_loss + aug_loss


if __name__ == "__main__":
    key = jax.random.PRNGKey(0)
    B = 4          # images per view -> forward sees 2B = 8 rows
    N = 1024       # memory-bank size (softmax classes / feature dim of x)
    K = 4          # neighbours per anchor

    k1, k2 = jax.random.split(key)
    x = jax.random.normal(k1, (2 * B, N), dtype=jnp.float32)
    y = jnp.array([3, 8, 500, 777], dtype=jnp.int32)   # mix of anchors/instances

    # ANs.position: even memory slots are anchors (row into the neighbour
    # table), odd slots are instances (-1).
    idx = jnp.arange(N, dtype=jnp.int32)
    position = jnp.where(idx % 2 == 0, idx // 2, -1).astype(jnp.int32)
    neighbours = jax.random.randint(k2, (N // 2, K), 0, N, dtype=jnp.int32)

    # (neg_m, T, MXU dtype, tolerance): f32 Gram is the default (free here);
    # the bf16 Gram path is still exercised with a looser bound.
    configs = [
        (1.0, 0.07, jnp.float32, 1e-3),
        (0.5, 0.50, jnp.float32, 1e-3),     # exercises the negM != 1 branch
        (1.0, 0.07, jnp.bfloat16, 2e-2),
    ]
    for neg_m, T, mdt, tol in configs:
        out = criterion_sand_forward(x, y, position, neighbours,
                                     neg_m=neg_m, temperature=T, mxu_dtype=mdt)
        out = jax.block_until_ready(out)
        ref = reference_forward(x, y, position, neighbours,
                                neg_m=neg_m, temperature=T)
        assert bool(jnp.isfinite(out)), (neg_m, T, mdt, out)
        assert jnp.allclose(out, ref, rtol=tol, atol=tol), (neg_m, T, mdt, out, ref)

    # Awkward bank size (N not a multiple of 128) with a forced small tile:
    # exercises the cdiv grid + in-kernel tail-masking path (3 grid steps).
    N2 = 1000
    x2 = jax.random.normal(jax.random.PRNGKey(1), (2 * B, N2), dtype=jnp.float32)
    idx2 = jnp.arange(N2, dtype=jnp.int32)
    position2 = jnp.where(idx2 % 2 == 0, idx2 // 2, -1).astype(jnp.int32)
    neighbours2 = jax.random.randint(jax.random.PRNGKey(2), (N2 // 2, K), 0, N2,
                                     dtype=jnp.int32)
    out2 = criterion_sand_forward(x2, y, position2, neighbours2,
                                  neg_m=1.0, temperature=0.07, block_k=384)
    out2 = jax.block_until_ready(out2)
    ref2 = reference_forward(x2, y, position2, neighbours2,
                             neg_m=1.0, temperature=0.07)
    assert jnp.allclose(out2, ref2, rtol=1e-3, atol=1e-3), (float(out2), float(ref2))

    # bf16 memory bank streamed end-to-end (halves HBM bytes), upcast in-kernel.
    xb = x.astype(jnp.bfloat16)
    outb = criterion_sand_forward(xb, y, position, neighbours,
                                  neg_m=1.0, temperature=0.07)
    outb = jax.block_until_ready(outb)
    refb = reference_forward(xb.astype(jnp.float32), y, position, neighbours,
                             neg_m=1.0, temperature=0.07)
    assert jnp.allclose(outb, refb, rtol=2e-3, atol=2e-3), (float(outb), float(refb))

    print("KERNEL_OK")
</pallas_src>

<mosaic_0001>
module attributes {stable_mosaic.version = 11 : i64} {
  func.func @_criterion_sand_kernel(%arg0: i32, %arg1: memref<8x1024xf32, #tpu.memory_space<vmem>>, %arg2: memref<8x5xf32, #tpu.memory_space<vmem>>, %arg3: memref<1x1xf32, #tpu.memory_space<vmem>>, %arg4: memref<8x8xf32, #tpu.memory_space<vmem>>, %arg5: memref<8x1xf32, #tpu.memory_space<vmem>>, %arg6: memref<8x1xf32, #tpu.memory_space<vmem>>) attributes {dimension_semantics = [#tpu.dimension_semantics<arbitrary>], iteration_bounds = array<i64: 1>, scalar_prefetch = 0 : i64, scratch_operands = 3 : i64, tpu.core_type = #tpu.core_type<tc>, window_params = [{transform_indices = @transform_0, window_bounds = array<i64: 8, 1024>}, {pipeline_mode = #tpu.pipeline_mode<synchronous>, transform_indices = @transform_1, window_bounds = array<i64: 8, 5>}, {pipeline_mode = #tpu.pipeline_mode<synchronous>, transform_indices = @transform_2, window_bounds = array<i64: 1, 1>}]} {
    %c0_i32 = arith.constant 0 : i32
    %0 = arith.cmpi eq, %arg0, %c0_i32 : i32
    %1 = arith.extui %0 : i1 to i32
    %c0_i32_0 = arith.constant 0 : i32
    %2 = arith.cmpi ne, %1, %c0_i32_0 : i32
    scf.if %2 {
      %cst_20 = arith.constant 0.000000e+00 : f32
      %28 = vector.broadcast %cst_20 : f32 to vector<8x8xf32>
      %c0_21 = arith.constant 0 : index
      %c0_22 = arith.constant 0 : index
      %29 = vector.load %arg4[%c0_21, %c0_22] : memref<8x8xf32, #tpu.memory_space<vmem>>, vector<8x8xf32>
      tpu.vector_store %arg4[%c0_21, %c0_22], %28 {strides = array<i32>} : memref<8x8xf32, #tpu.memory_space<vmem>>, vector<8x8xf32>,
      %cst_23 = arith.constant 0xFF800000 : f32
      %30 = vector.broadcast %cst_23 : f32 to vector<8x1xf32>
      %c0_24 = arith.constant 0 : index
      %c0_25 = arith.constant 0 : index
      %31 = vector.load %arg5[%c0_24, %c0_25] : memref<8x1xf32, #tpu.memory_space<vmem>>, vector<8x1xf32>
      tpu.vector_store %arg5[%c0_24, %c0_25], %30 {strides = array<i32>} : memref<8x1xf32, #tpu.memory_space<vmem>>, vector<8x1xf32>,
      %cst_26 = arith.constant 0.000000e+00 : f32
      %32 = vector.broadcast %cst_26 : f32 to vector<8x1xf32>
      %c0_27 = arith.constant 0 : index
      %c0_28 = arith.constant 0 : index
      %33 = vector.load %arg6[%c0_27, %c0_28] : memref<8x1xf32, #tpu.memory_space<vmem>>, vector<8x1xf32>
      tpu.vector_store %arg6[%c0_27, %c0_28], %32 {strides = array<i32>} : memref<8x1xf32, #tpu.memory_space<vmem>>, vector<8x1xf32>,
    } else {
    }
    %c0 = arith.constant 0 : index
    %c0_1 = arith.constant 0 : index
    %3 = vector.load %arg1[%c0, %c0_1] : memref<8x1024xf32, #tpu.memory_space<vmem>>, vector<8x1024xf32>
    %cst = arith.constant dense<0xFF800000> : vector<8xf32>
    %4 = vector.multi_reduction <maximumf>, %3, %cst [1] : vector<8x1024xf32> to vector<8xf32>
    %5 = vector.shape_cast %4 : vector<8xf32> to vector<8x1xf32>
    %c0_2 = arith.constant 0 : index
    %c0_3 = arith.constant 0 : index
    %6 = vector.load %arg5[%c0_2, %c0_3] : memref<8x1xf32, #tpu.memory_space<vmem>>, vector<8x1xf32>
    %7 = arith.maximumf %6, %5 : vector<8x1xf32>
    %c0_4 = arith.constant 0 : index
    %c0_5 = arith.constant 0 : index
    %8 = vector.load %arg5[%c0_4, %c0_5] : memref<8x1xf32, #tpu.memory_space<vmem>>, vector<8x1xf32>
    %9 = arith.subf %8, %7 : vector<8x1xf32>
    %10 = math.exp %9 : vector<8x1xf32>
    %11 = vector.broadcast %7 : vector<8x1xf32> to vector<8x1024xf32>
    %12 = arith.subf %3, %11 : vector<8x1024xf32>
    %13 = math.exp %12 : vector<8x1024xf32>
    %c0_6 = arith.constant 0 : index
    %c0_7 = arith.constant 0 : index
    %14 = vector.load %arg6[%c0_6, %c0_7] : memref<8x1xf32, #tpu.memory_space<vmem>>, vector<8x1xf32>
    %15 = arith.mulf %10, %14 : vector<8x1xf32>
    %cst_8 = arith.constant dense<0.000000e+00> : vector<8xf32>
    %16 = vector.multi_reduction <add>, %13, %cst_8 [1] : vector<8x1024xf32> to vector<8xf32>
    %17 = vector.shape_cast %16 : vector<8xf32> to vector<8x1xf32>
    %18 = arith.addf %15, %17 : vector<8x1xf32>
    %c0_9 = arith.constant 0 : index
    %c0_10 = arith.constant 0 : index
    %19 = vector.load %arg6[%c0_9, %c0_10] : memref<8x1xf32, #tpu.memory_space<vmem>>, vector<8x1xf32>
    tpu.vector_store %arg6[%c0_9, %c0_10], %18 {strides = array<i32>} : memref<8x1xf32, #tpu.memory_space<vmem>>, vector<8x1xf32>,
    %c0_11 = arith.constant 0 : index
    %c0_12 = arith.constant 0 : index
    %20 = vector.load %arg5[%c0_11, %c0_12] : memref<8x1xf32, #tpu.memory_space<vmem>>, vector<8x1xf32>
    tpu.vector_store %arg5[%c0_11, %c0_12], %7 {strides = array<i32>} : memref<8x1xf32, #tpu.memory_space<vmem>>, vector<8x1xf32>,
    %c0_13 = arith.constant 0 : index
    %c0_14 = arith.constant 0 : index
    %21 = vector.load %arg4[%c0_13, %c0_14] : memref<8x8xf32, #tpu.memory_space<vmem>>, vector<8x8xf32>
    %cst_15 = arith.constant dense<0.000000e+00> : vector<8x8xf32>
    %22 = tpu.matmul %3, %3, %cst_15 {dimension_numbers = #tpu.dot_dimension_numbers<[1], [1], [0], [0], [0, 0, 1, 0], [], []>} : vector<8x1024xf32>, vector<8x1024xf32>, vector<8x8xf32> -> vector<8x8xf32>
    %23 = arith.addf %21, %22 : vector<8x8xf32>
    %c0_16 = arith.constant 0 : index
    %c0_17 = arith.constant 0 : index
    %24 = vector.load %arg4[%c0_16, %c0_17] : memref<8x8xf32, #tpu.memory_space<vmem>>, vector<8x8xf32>
    tpu.vector_store %arg4[%c0_16, %c0_17], %23 {strides = array<i32>} : memref<8x8xf32, #tpu.memory_space<vmem>>, vector<8x8xf32>,
    %c0_i32_18 = arith.constant 0 : i32
    %25 = arith.cmpi eq, %arg0, %c0_i32_18 : i32
    %26 = arith.extui %25 : i1 to i32
    %c0_i32_19 = arith.constant 0 : i32
    %27 = arith.cmpi ne, %26, %c0_i32_19 : i32
    scf.if %27 {
      %c0_20 = arith.constant 0 : index
      %c0_21 = arith.constant 0 : index
      %28 = vector.load %arg2[%c0_20, %c0_21] : memref<8x5xf32, #tpu.memory_space<vmem>>, vector<8x5xf32>
      %cst_22 = arith.constant dense<0xFF800000> : vector<8xf32>
      %29 = vector.multi_reduction <maximumf>, %28, %cst_22 [1] : vector<8x5xf32> to vector<8xf32>
      %30 = vector.shape_cast %29 : vector<8xf32> to vector<8x1xf32>
      %31 = vector.broadcast %30 : vector<8x1xf32> to vector<8x5xf32>
      %32 = arith.subf %28, %31 : vector<8x5xf32>
      %33 = math.exp %32 : vector<8x5xf32>
      %cst_23 = arith.constant dense<0.000000e+00> : vector<8xf32>
      %34 = vector.multi_reduction <add>, %33, %cst_23 [1] : vector<8x5xf32> to vector<8xf32>
      %35 = vector.shape_cast %34 : vector<8xf32> to vector<8x1xf32>
      %36 = math.log %35 : vector<8x1xf32>
      %37 = arith.addf %30, %36 : vector<8x1xf32>
      %c0_24 = arith.constant 0 : index
      %c0_25 = arith.constant 0 : index
      %38 = vector.load %arg5[%c0_24, %c0_25] : memref<8x1xf32, #tpu.memory_space<vmem>>, vector<8x1xf32>
      %c0_26 = arith.constant 0 : index
      %c0_27 = arith.constant 0 : index
      %39 = vector.load %arg6[%c0_26, %c0_27] : memref<8x1xf32, #tpu.memory_space<vmem>>, vector<8x1xf32>
      %40 = math.log %39 : vector<8x1xf32>
      %41 = arith.addf %38, %40 : vector<8x1xf32>
      %42 = arith.subf %41, %37 : vector<8x1xf32>
      %43 = vector.shape_cast %42 : vector<8x1xf32> to vector<1x8x1xf32>
      %cst_28 = arith.constant dense<0.000000e+00> : vector<1xf32>
      %44 = vector.multi_reduction <add>, %43, %cst_28 [1, 2] : vector<1x8x1xf32> to vector<1xf32>
      %45 = vector.shape_cast %44 : vector<1xf32> to vector<1x1x1xf32>
      %46 = vector.extract %45[0, 0, 0] : f32 from vector<1x1x1xf32>
      %47 = vector.broadcast %46 : f32 to vector<1x1xf32>
      %c0_29 = arith.constant 0 : index
      %c0_30 = arith.constant 0 : index
      %48 = vector.load %arg4[%c0_29, %c0_30] : memref<8x8xf32, #tpu.memory_space<vmem>>, vector<8x8xf32>
      %49 = tpu.iota {dimensions = array<i32: 0>} : vector<8x8xi32>
      %50 = tpu.iota {dimensions = array<i32: 1>} : vector<8x8xi32>
      %51 = arith.cmpi eq, %49, %50 : vector<8x8xi32>
      %cst_31 = arith.constant 0.000000e+00 : f32
      %52 = vector.broadcast %cst_31 : f32 to vector<8x8xf32>
      %53 = arith.select %51, %48, %52 : vector<8x8xi1>, vector<8x8xf32>
      %cst_32 = arith.constant dense<0.000000e+00> : vector<8xf32>
      %54 = vector.multi_reduction <add>, %53, %cst_32 [1] : vector<8x8xf32> to vector<8xf32>
      %55 = vector.shape_cast %54 : vector<8xf32> to vector<8x1xf32>
      %cst_33 = arith.constant 1.000000e-24 : f32
      %56 = vector.broadcast %cst_33 : f32 to vector<8x1xf32>
      %57 = arith.maximumf %55, %56 : vector<8x1xf32>
      %58 = math.rsqrt %57 : vector<8x1xf32>
      %cst_34 = arith.constant dense<0.000000e+00> : vector<8x8xf32>
      %59 = tpu.matmul %58, %58, %cst_34 {dimension_numbers = #tpu.dot_dimension_numbers<[1], [1], [0], [0], [0, 0, 1, 0], [], []>} : vector<8x1xf32>, vector<8x1xf32>, vector<8x8xf32> -> vector<8x8xf32>
      %60 = arith.mulf %48, %59 : vector<8x8xf32>
      %cst_35 = arith.constant 14.2857141 : f32
      %61 = vector.broadcast %cst_35 : f32 to vector<8x8xf32>
      %62 = arith.mulf %60, %61 : vector<8x8xf32>
      %63 = math.exp %62 : vector<8x8xf32>
      %cst_36 = arith.constant 0.000000e+00 : f32
      %64 = vector.broadcast %cst_36 : f32 to vector<8x8xf32>
      %65 = arith.select %51, %64, %63 : vector<8x8xi1>, vector<8x8xf32>
      %c4_i32 = arith.constant 4 : i32
      %66 = vector.broadcast %c4_i32 : i32 to vector<8x8xi32>
      %67 = arith.addi %49, %66 : vector<8x8xi32>
      %68 = arith.cmpi eq, %50, %67 : vector<8x8xi32>
      %c4_i32_37 = arith.constant 4 : i32
      %69 = vector.broadcast %c4_i32_37 : i32 to vector<8x8xi32>
      %70 = arith.subi %49, %69 : vector<8x8xi32>
      %71 = arith.cmpi eq, %50, %70 : vector<8x8xi32>
      %72 = arith.ori %68, %71 : vector<8x8xi1>
      %cst_38 = arith.constant 0.000000e+00 : f32
      %73 = vector.broadcast %cst_38 : f32 to vector<8x8xf32>
      %74 = arith.select %72, %65, %73 : vector<8x8xi1>, vector<8x8xf32>
      %cst_39 = arith.constant dense<0.000000e+00> : vector<8xf32>
      %75 = vector.multi_reduction <add>, %74, %cst_39 [1] : vector<8x8xf32> to vector<8xf32>
      %76 = vector.shape_cast %75 : vector<8xf32> to vector<8x1xf32>
      %cst_40 = arith.constant dense<0.000000e+00> : vector<8xf32>
      %77 = vector.multi_reduction <add>, %65, %cst_40 [1] : vector<8x8xf32> to vector<8xf32>
      %78 = vector.shape_cast %77 : vector<8xf32> to vector<8x1xf32>
      %79 = tpu.reciprocal %78 : vector<8x1xf32> -> vector<8x1xf32>
      %80 = arith.mulf %76, %79 : vector<8x1xf32>
      %81 = vector.broadcast %79 : vector<8x1xf32> to vector<8x8xf32>
      %82 = arith.mulf %65, %81 : vector<8x8xf32>
      %cst_41 = arith.constant 1.000000e+00 : f32
      %83 = vector.broadcast %cst_41 : f32 to vector<8x8xf32>
      %84 = arith.subf %83, %82 : vector<8x8xf32>
      %85 = math.log %84 : vector<8x8xf32>
      %cst_42 = arith.constant dense<0.000000e+00> : vector<8xf32>
      %86 = vector.multi_reduction <add>, %85, %cst_42 [1] : vector<8x8xf32> to vector<8xf32>
      %87 = vector.shape_cast %86 : vector<8xf32> to vector<8x1xf32>
      %cst_43 = arith.constant 1.000000e+00 : f32
      %88 = vector.broadcast %cst_43 : f32 to vector<8x1xf32>
      %89 = arith.subf %88, %80 : vector<8x1xf32>
      %90 = math.log %89 : vector<8x1xf32>
      %91 = arith.subf %87, %90 : vector<8x1xf32>
      %92 = math.log %80 : vector<8x1xf32>
      %93 = vector.shape_cast %92 : vector<8x1xf32> to vector<1x8x1xf32>
      %cst_44 = arith.constant dense<0.000000e+00> : vector<1xf32>
      %94 = vector.multi_reduction <add>, %93, %cst_44 [1, 2] : vector<1x8x1xf32> to vector<1xf32>
      %95 = vector.shape_cast %94 : vector<1xf32> to vector<1x1x1xf32>
      %96 = vector.extract %95[0, 0, 0] : f32 from vector<1x1x1xf32>
      %97 = vector.broadcast %96 : f32 to vector<1x1xf32>
      %98 = vector.shape_cast %91 : vector<8x1xf32> to vector<1x8x1xf32>
      %cst_45 = arith.constant dense<0.000000e+00> : vector<1xf32>
      %99 = vector.multi_reduction <add>, %98, %cst_45 [1, 2] : vector<1x8x1xf32> to vector<1xf32>
      %100 = vector.shape_cast %99 : vector<1xf32> to vector<1x1x1xf32>
      %101 = vector.extract %100[0, 0, 0] : f32 from vector<1x1x1xf32>
      %102 = vector.broadcast %101 : f32 to vector<1x1xf32>
      %cst_46 = arith.constant 1.000000e+00 : f32
      %103 = vector.broadcast %cst_46 : f32 to vector<1x1xf32>
      %104 = arith.mulf %103, %102 : vector<1x1xf32>
      %105 = arith.addf %97, %104 : vector<1x1xf32>
      %106 = arith.subf %47, %105 : vector<1x1xf32>
      %cst_47 = arith.constant 1.250000e-01 : f32
      %107 = vector.broadcast %cst_47 : f32 to vector<1x1xf32>
      %108 = arith.mulf %106, %107 : vector<1x1xf32>
      %c0_48 = arith.constant 0 : index
      %c0_49 = arith.constant 0 : index
      %109 = vector.load %arg3[%c0_48, %c0_49] : memref<1x1xf32, #tpu.memory_space<vmem>>, vector<1x1xf32>
      tpu.vector_store %arg3[%c0_48, %c0_49], %108 {strides = array<i32>} : memref<1x1xf32, #tpu.memory_space<vmem>>, vector<1x1xf32>,
    } else {
    }
    return
  }
  func.func @transform_0(%arg0: i32) -> (i32, i32) {
    %c0_i32 = arith.constant 0 : i32
    %c0_i32_0 = arith.constant 0 : i32
    return %c0_i32, %arg0 : i32, i32
  }
  func.func @transform_1(%arg0: i32) -> (i32, i32) {
    %c0_i32 = arith.constant 0 : i32
    %c0_i32_0 = arith.constant 0 : i32
    %c0_i32_1 = arith.constant 0 : i32
    return %c0_i32, %c0_i32_0 : i32, i32
  }
  func.func @transform_2(%arg0: i32) -> (i32, i32) {
    %c0_i32 = arith.constant 0 : i32
    %c0_i32_0 = arith.constant 0 : i32
    %c0_i32_1 = arith.constant 0 : i32
    return %c0_i32, %c0_i32_0 : i32, i32
  }
}

</mosaic_0001>

<bundles_post_ra>
// kernel: tpu_custom_call.1
= control target key start
LH: loop header
LB: loop body
LE: loop exit
PB: predicated region body
PF: predicated region fallthrough
CT: control target
= control target key end

     0   :  { %7 = vsyncpa [#allocation6], 0  ;;  %s873_s0 = inlined_call_operand.hbm [shape: f32[8,1024], index: 0, kind: input, shape index: {}]   ;;  %s874_s1 = inlined_call_operand.hbm [shape: f32[8,5], index: 1, kind: input, shape index: {}]   ;;  %s875_s2 = inlined_call_operand.hbm [shape: f32[1,1], index: 2, kind: output, shape index: {}]  }
   0x1   :  { %8 = vsyncpa [#allocation9], 0 }
   0x2   :  { %9 = vsyncpa [#allocation7], 0  ;;  %s722_s9 = smov [#allocation5]   ;;  %s723_s11 = smov [#allocation8]  }
   0x3   :  { %s16_s10 = sshll.u32 %s722_s9, 4  ;;  %s26_s12 = sshll.u32 %s723_s11, 4  ;;  %s17_s10 = int_to_ptr.vmem [resolvable:$true] %s16_s10  ;;  %s27_s12 = int_to_ptr.vmem [resolvable:$true] %s26_s12 }
   0x4   :  { %s650_s15 = scalar_lea.hbm %s873_s0, 1024 }
   0x5   :  { %p651_p0 = scmp.ne.s32.totalorder %s873_s0, %s650_s15  ;;  %p654_p1 = scmp.lt.u32.totalorder %s650_s15, %s873_s0 }
   0x7   :  { %p656_p2 = pnand %p654_p1, %p651_p0 }
   0x9   :  { %659 = shalt.err (!%p656_p2)
}
   0xa   :  { %s660_s20 = scalar_lea.vmem %s17_s10, 1024  ;;  %p665_p4 = scmp.lt.s32.totalorder %s17_s10, %s17_s10 }
   0xb   :  { %p661_p3 = scmp.ne.s32.totalorder %s17_s10, %s660_s20  ;;  %p666_p5 = scmp.lt.s32.totalorder %s660_s20, %s660_s20 }
   0xd   :  { %p667_p6 = por %p666_p5, %p665_p4 }
   0xf   :  { %p668_p7 = pnand %p667_p6, %p661_p3 }
  0x11   :  { %671 = shalt.err (!%p668_p7)
}
  0x12   :  { %19 = dma.hbm_to_vmem [thread:$0]  %s873_s0, 1024, %s17_s10, [#allocation6]  }
  0x13   :  { %s672_s25 = scalar_lea.hbm %s874_s1, 128 }
  0x14   :  { %p673_p8 = scmp.ne.s32.totalorder %s874_s1, %s672_s25  ;;  %p676_p9 = scmp.lt.u32.totalorder %s672_s25, %s874_s1 }
  0x16   :  { %p678_p10 = pnand %p676_p9, %p673_p8 }
  0x18   :  { %681 = shalt.err (!%p678_p10)
}
  0x19   :  { %s682_s30 = scalar_lea.vmem %s27_s12, 128  ;;  %p687_p12 = scmp.lt.s32.totalorder %s27_s12, %s27_s12 }
  0x1a   :  { %p683_p11 = scmp.ne.s32.totalorder %s27_s12, %s682_s30  ;;  %p688_p13 = scmp.lt.s32.totalorder %s682_s30, %s682_s30 }
  0x1c   :  { %p689_p0 = por %p688_p13, %p687_p12 }
  0x1e   :  { %p690_p1 = pnand %p689_p0, %p683_p11 }
  0x20   :  { %693 = shalt.err (!%p690_p1)
}
  0x21   :  { %29 = dma.hbm_to_vmem [thread:$0]  %s874_s1, 128, %s27_s12, [#allocation9]  }
  0x22   :  { %716 = dma.done.wait [#allocation6], 1024  }
  0x23   :  { %717 = vsyncadd [#allocation6], 4294966272 }
  0x24   :  { %718 = dma.done.wait [#allocation9], 128  }
  0x25   :  { %719 = vsyncadd [#allocation9], 4294967168  ;;  %v768_v0 = vld [vmem:[#allocation5 + $0x8] sm:$0xff]  ;;  %v770_v1 = vld [vmem:[#allocation5 + $0x18] sm:$0xff]  ;;  %vm40_vm0 = vcmask 64512   ;;  %v724_v8 = vmov 0.0   ;;  %v430_v21 = vlaneseq }
  0x26   :  { %v772_v2 = vld [vmem:[#allocation5] sm:$0xff]  ;;  %112 = vmatprep.subr.mxu0 %v768_v0  ;;  %182 = vmatprep.subr.mxu1 %v770_v1  ;;  %v776_v3 = vld [vmem:[#allocation5 + $0x10] sm:$0xff]  ;;  %v778_v4 = vld [vmem:[#allocation5 + $0x28] sm:$0xff]  ;;  %41 = vst.msk [vmem:[#allocation2] sm:$0xff] %vm40_vm0, %v724_v8  ;;  %vm42_vm2 = vcmask 7168   ;;  %vm725_vm3 = vmmov 0  }
  0x27   :  { %113 = vmatpush1.xpose.msra.mxu0 %v772_v2  ;;  %183 = vmatpush1.xpose.msra.mxu1 %v776_v3  ;;  %v782_v5 = vld [vmem:[#allocation5 + $0x38] sm:$0xff]  ;;  %v786_v6 = vld [vmem:[#allocation5 + $0x20] sm:$0xff]  ;;  %v788_v7 = vld [vmem:[#allocation5 + $0x30] sm:$0xff]  ;;  %v802_v23 = vshrl.u32 %v430_v21, 7  ;;  %v804_v24 = vand.u32 127, %v430_v21  ;;  %v54_v26 = vmax.f32 %v768_v0, %v778_v4  ;;  %44 = vst.msk [vmem:[#allocation4] sm:$0xff] %vm42_vm2, %v724_v8 }
  0x28   :  { %176 = vmatprep.mubr.f32.mxu0 %v768_v0  ;;  %246 = vmatprep.mubr.f32.mxu1 %v770_v1  ;;  %v53_v25 = vmax.f32 %v772_v2, %v786_v6  ;;  %v55_v27 = vmax.f32 %v776_v3, %v788_v7  ;;  %v56_v28 = vmax.f32 %v770_v1, %v782_v5  ;;  %v726_v35 = vmov -inf   ;;  %v398_v44 = vld [vmem:[#allocation8] sm:$0xff]  ;;  %s728_s6 = smov [#allocation10]  }
  0x29   :  { %252 = vmatprep.subr.mxu0 %v778_v4  ;;  %322 = vmatprep.subr.mxu1 %v782_v5  ;;  %vm434_vm1 = vcmp.eq.s32.totalorder %v802_v23, %v804_v24  ;;  %43 = vst.msk [vmem:[#allocation3] sm:$0xff] %vm42_vm2, %v726_v35  ;;  %v727_v36 = vmov 0   ;;  %vm399_vm4 = vcmask 39936   ;;  %s579_s7 = sshll.u32 %s728_s6, 4  ;;  %vm571_vm8 = vcmask 0   ;;  %s580_s7 = int_to_ptr.vmem [resolvable:$true] %s579_s7 }
  0x2a   :  { %177 = vmatmul.mubr.f32.vlgmr.msra.gmra.mrb[0].mxu0 %v772_v2  ;;  %247 = vmatmul.mubr.f32.vlgmr.msra.gmra.mrb[0].mxu1 %v776_v3  ;;  %v57_v29 = vmax.f32 %v53_v25, %v54_v26  ;;  %v58_v30 = vmax.f32 %v55_v27, %v56_v28  ;;  %v400_v45 = vsel %vm399_vm4, %v398_v44, -inf  ;;  %s694_s8 = scalar_lea.vmem %s580_s7, 16  ;;  %s698_s9 = scalar_lea.vmem %s580_s7, 32 }
  0x2b   :  { %253 = vmatpush1.xpose.msra.mxu0 %v786_v6  ;;  %323 = vmatpush1.xpose.msra.mxu1 %v788_v7  ;;  %p695_p2 = scmp.ne.s32.totalorder %s580_s7, %s694_s8  ;;  %p699_p3 = scmp.lt.s32.totalorder %s580_s7, %s580_s7 }
  0x2c   :  { %316 = vmatprep.mubr.f32.mxu0 %v778_v4  ;;  %386 = vmatprep.mubr.f32.mxu1 %v782_v5  ;;  %v59_v34 = vmax.f32 %v57_v29, %v58_v30  ;;  %p700_p4 = scmp.lt.s32.totalorder %s698_s9, %s694_s8 }
  0x2d   :  { %594 = vmatprep.subr.mxu0 %v724_v8  ;;  %v111_v19 = vld [vmem:[#allocation2] sm:$0xff]  ;;  %612 = vset.pattern.permute.xlu1 %v727_v36 }
  0x2e   :  { %317 = vmatmul.mubr.f32.vlgmr.msra.gmra.mrb[2].mxu0 %v786_v6  ;;  %387 = vmatmul.mubr.f32.vlgmr.msra.gmra.mrb[2].mxu1 %v788_v7  ;;  %p701_p5 = por %p700_p4, %p699_p3 }
  0x2f   :  { %596 = vmatprep.mubr.msk.f32.mxu0 %vm725_vm3, %v724_v8  ;;  %613 = vset.pattern.permute.xlu0 %v727_v36 }
  0x30   :  { %v822_v39 = vld [vmem:[#allocation3] sm:$0xff]  ;;  %p702_p6 = pnand %p701_p5, %p695_p2 }
  0xfd   :  { %v178_v9 = vpop.f32.mrb[0].mxu0  ;;  %v248_v10 = vpop.f32.mrb[0].mxu1 }
  0xfe   :  { %v249_v11 = vadd.f32 %v248_v10, %v178_v9  ;;  %v180_v12 = vpop.f32.mrb[1].mxu0  ;;  %v250_v13 = vpop.f32.mrb[1].mxu1 }
 0x101   :  { %v318_v14 = vpop.f32.mrb[2].mxu0  ;;  %v388_v15 = vpop.f32.mrb[2].mxu1 }
 0x102   :  { %v319_v16 = vadd.f32 %v318_v14, %v249_v11  ;;  %v320_v17 = vpop.f32.mrb[3].mxu0  ;;  %v390_v18 = vpop.f32.mrb[3].mxu1 }
 0x104   :  { %v389_v20 = vadd.f32 %v388_v15, %v319_v16 }
 0x106   :  { %v392_v22 = vadd.f32 %v389_v20, %v111_v19  ;;  %v519_v19 = vadd.s32 4, %v802_v23  ;;  %v591_v20 = vadd.s32 4294967292, %v802_v23 }
 0x108   :  { %394 = vst.msk [vmem:[#allocation2] sm:$0xff] %vm40_vm0, %v392_v22  ;;  %vm520_vm5 = vcmp.eq.s32.totalorder %v804_v24, %v519_v19  ;;  %vm522_vm6 = vcmp.eq.s32.totalorder %v804_v24, %v591_v20 }
 0x109   :  { %vm523_vm7 = vmor %vm520_vm5, %vm522_vm6 }
 0x10f   :  { %v429_v31 = vld [vmem:[#allocation2] sm:$0xff] }
 0x110   :  { %v435_v32 = vsel %vm434_vm1, %v429_v31, 0.0 }
 0x111   :  { %v436_v33 = vsel %vm40_vm0, %v435_v32, 0.0 }
 0x112   :  { %437 = vadd.xlane.f32.xlu0 %v436_v33 }
 0x116   :  { %60 = vmax.xlane.f32.xlu0 %v59_v34  ;;  %v96_v34 = vld [vmem:[#allocation4] sm:$0xff] }
 0x19f   :  { %v438_v37 = vpop.xlane.xlu0 %437 }
 0x1a0   :  { %v439_v38 = vmax.f32 %v438_v37, 1e-24 }
 0x1a2   :  { %614 = vrsqrt.f32 %v439_v38 }
 0x1a3   :  { %v61_v40 = vpop.xlane.xlu0 %60 }
 0x1a4   :  { %v825_v41 = vmax.f32 %v822_v39, %v61_v40 }
 0x1a6   :  { %v64_v42 = vsub.f32 %v822_v39, %v825_v41  ;;  %110 = vst.msk [vmem:[#allocation3] sm:$0xff] %vm42_vm2, %v825_v41  ;;  %69 = vperm.xlu1 %612, %v825_v41  }
 0x1a8   :  { %v65_v23 = vmul.f32 1.442695, %v64_v42 }
 0x1ac   :  { %v615_v43 = vpop.eup %614 }
 0x1ad   :  { %595 = vmatpush3.xpose.msk.msra.mxu0 %vm42_vm2, %v615_v43 }
 0x1b0   :  { %597 = vmatmul.mubr.msk.f32.vlgmr.msra.gmra.mrb[4].mxu0 %vm42_vm2, %v615_v43 }
 0x1ca   :  { %401 = vmax.xlane.f32.xlu1 %v400_v45 }
 0x225   :  { %v70_v46 = vpop.permute.xlu1 %69 }
 0x226   :  { %v72_v47 = vsub.f32 %v772_v2, %v70_v46  ;;  %v73_v48 = vsub.f32 %v768_v0, %v70_v46  ;;  %v74_v50 = vsub.f32 %v776_v3, %v70_v46  ;;  %v75_v52 = vsub.f32 %v770_v1, %v70_v46 }
 0x227   :  { %v76_v55 = vsub.f32 %v786_v6, %v70_v46  ;;  %v77_v56 = vsub.f32 %v778_v4, %v70_v46  ;;  %v78_v60 = vsub.f32 %v788_v7, %v70_v46  ;;  %v79_v0 = vsub.f32 %v782_v5, %v70_v46 }
 0x228   :  { %v80_v49 = vmul.f32 1.442695, %v72_v47  ;;  %v82_v51 = vmul.f32 1.442695, %v73_v48  ;;  %v84_v53 = vmul.f32 1.442695, %v74_v50 }
 0x229   :  { %v86_v54 = vmul.f32 1.442695, %v75_v52  ;;  %v88_v57 = vmul.f32 1.442695, %v76_v55  ;;  %v90_v61 = vmul.f32 1.442695, %v77_v56 }
 0x22a   :  { %616 = vpow2.f32 %v80_v49  ;;  %v92_v1 = vmul.f32 1.442695, %v78_v60  ;;  %v94_v4 = vmul.f32 1.442695, %v79_v0  ;;  %v412_v50 = vld [vmem:[#allocation3] sm:$0xff] }
 0x22b   :  { %618 = vpow2.f32 %v82_v51 }
 0x22c   :  { %620 = vpow2.f32 %v84_v53 }
 0x22d   :  { %622 = vpow2.f32 %v86_v54 }
 0x22e   :  { %624 = vpow2.f32 %v88_v57 }
 0x22f   :  { %626 = vpow2.f32 %v90_v61 }
 0x230   :  { %628 = vpow2.f32 %v92_v1 }
 0x231   :  { %630 = vpow2.f32 %v94_v4 }
 0x234   :  { %v617_v58 = vpop.eup %616 }
 0x235   :  { %v619_v59 = vpop.eup %618 }
 0x236   :  { %v98_v62 = vadd.f32 %v619_v59, %v617_v58  ;;  %v621_v63 = vpop.eup %620 }
 0x237   :  { %v623_v8 = vpop.eup %622 }
 0x238   :  { %v99_v3 = vadd.f32 %v621_v63, %v98_v62  ;;  %v625_v12 = vpop.eup %624 }
 0x239   :  { %v627_v16 = vpop.eup %626 }
 0x23a   :  { %v100_v11 = vadd.f32 %v623_v8, %v99_v3  ;;  %v629_v18 = vpop.eup %628 }
 0x23b   :  { %v631_v21 = vpop.eup %630 }
 0x23c   :  { %v101_v15 = vadd.f32 %v625_v12, %v100_v11 }
 0x23e   :  { %v102_v17 = vadd.f32 %v627_v16, %v101_v15 }
 0x240   :  { %v103_v22 = vadd.f32 %v629_v18, %v102_v17 }
 0x242   :  { %v104_v28 = vadd.f32 %v631_v21, %v103_v22 }
 0x257   :  { %v402_v7 = vpop.xlane.xlu1 %401 }
 0x258   :  { %v403_v14 = vsub.f32 %v398_v44, %v402_v7 }
 0x25a   :  { %v404_v5 = vmul.f32 1.442695, %v403_v14 }
 0x283   :  { %v510_v2 = vpop.f32.mrb[4].mxu0 }
 0x284   :  { %v514_v6 = vmul.f32 %v510_v2, %v429_v31  ;;  %v598_v9 = vpop.f32.mrb[5].mxu0 }
 0x286   :  { %v515_v10 = vmul.f32 14.285714, %v514_v6 }
 0x288   :  { %v516_v13 = vmul.f32 1.442695, %v515_v10 }
 0x28a   :  { %632 = vpow2.f32 %v516_v13 }
 0x28b   :  { %634 = vpow2.f32 %v404_v5 }
 0x28c   :  { %636 = vpow2.f32 %v65_v23 }
 0x294   :  { %v633_v25 = vpop.eup %632 }
 0x295   :  { %v518_v26 = vsel %vm434_vm1, 0.0, %v633_v25  ;;  %v635_v30 = vpop.eup %634 }
 0x296   :  { %v528_v27 = vsel %vm40_vm0, %v518_v26, 0.0  ;;  %v524_v29 = vsel %vm523_vm7, %v518_v26, 0.0  ;;  %v406_v32 = vsel %vm399_vm4, %v635_v30, 0.0  ;;  %v637_v24 = vpop.eup %636 }
 0x297   :  { %529 = vadd.xlane.f32.xlu0 %v528_v27  ;;  %v525_v31 = vsel %vm40_vm0, %v524_v29, 0.0  ;;  %v97_v35 = vmul.f32 %v637_v24, %v96_v34 }
 0x29b   :  { %105 = vadd.xlane.f32.xlu0 %v104_v28 }
 0x29f   :  { %526 = vadd.xlane.f32.xlu0 %v525_v31 }
 0x2a3   :  { %407 = vadd.xlane.f32.xlu0 %v406_v32 }
 0x324   :  { %v530_v33 = vpop.xlane.xlu0 %529 }
 0x325   :  { %638 = vrcp.f32 %v530_v33 }
 0x328   :  { %v106_v36 = vpop.xlane.xlu0 %105 }
 0x329   :  { %v107_v37 = vadd.f32 %v106_v36, %v97_v35 }
 0x32b   :  { %109 = vst.msk [vmem:[#allocation4] sm:$0xff] %vm42_vm2, %v107_v37 }
 0x32c   :  { %v527_v38 = vpop.xlane.xlu0 %526 }
 0x32f   :  { %v639_v40 = vpop.eup %638 }
 0x330   :  { %v408_v43 = vpop.xlane.xlu0 %407  ;;  %v533_v44 = vmul.f32 %v639_v40, %v518_v26  ;;  %v532_v39 = vmul.f32 %v639_v40, %v527_v38 }
 0x331   :  { %640 = vlog2.f32 %v408_v43 }
 0x332   :  { %v534_v45 = vsub.f32 1.0, %v533_v44  ;;  %v413_v46 = vld [vmem:[#allocation4] sm:$0xff]  ;;  %v540_v60 = vsub.f32 1.0, %v532_v39 }
 0x333   :  { %642 = vlog2.f32 %v413_v46 }
 0x334   :  { %644 = vlog2.f32 %v534_v45 }
 0x335   :  { %646 = vlog2.f32 %v532_v39 }
 0x336   :  { %648 = vlog2.f32 %v540_v60 }
 0x33b   :  { %v641_v41 = vpop.eup %640 }
 0x33c   :  { %v410_v42 = vmul.f32 0.6931472, %v641_v41 }
 0x33d   :  { %v643_v47 = vpop.eup %642 }
 0x33e   :  { %v415_v48 = vmul.f32 0.6931472, %v643_v47  ;;  %v645_v49 = vpop.eup %644  ;;  %v411_v52 = vadd.f32 %v410_v42, %v402_v7 }
 0x33f   :  { %v536_v51 = vmul.f32 0.6931472, %v645_v49  ;;  %v647_v56 = vpop.eup %646 }
 0x340   :  { %v416_v53 = vadd.f32 %v415_v48, %v412_v50  ;;  %v545_v58 = vmul.f32 0.6931472, %v647_v56  ;;  %v649_v61 = vpop.eup %648 }
 0x341   :  { %v537_v54 = vsel %vm40_vm0, %v536_v51, 0.0  ;;  %v542_v62 = vmul.f32 0.6931472, %v649_v61 }
 0x342   :  { %v417_v55 = vsub.f32 %v416_v53, %v411_v52  ;;  %538 = vadd.xlane.f32.xlu0 %v537_v54  ;;  %v546_v59 = vsel %vm42_vm2, %v545_v58, 0.0 }
 0x344   :  { %v418_v57 = vsel %vm42_vm2, %v417_v55, 0.0 }
 0x346   :  { %419 = vadd.xlane.f32.xlu0 %v418_v57 }
 0x34a   :  { %547 = vadd.xlane.f32.xlu0 %v546_v59 }
 0x3cf   :  { %v539_v63 = vpop.xlane.xlu0 %538 }
 0x3d0   :  { %v543_v0 = vsub.f32 %v539_v63, %v542_v62 }
 0x3d2   :  { %v557_v1 = vsel %vm42_vm2, %v543_v0, 0.0 }
 0x3d3   :  { %558 = vadd.xlane.f32.xlu0 %v557_v1  ;;  %v420_v2 = vpop.xlane.xlu0 %419 }
 0x3d4   :  { %v421_v3 = vrot.slane %v420_v2, 4 }
 0x3d6   :  { %v422_v8 = vadd.f32 %v421_v3, %v420_v2 }
 0x3d7   :  { %v548_v6 = vpop.xlane.xlu0 %547 }
 0x3d8   :  { %v423_v9 = vrot.slane %v422_v8, 2  ;;  %v549_v4 = vrot.slane %v548_v6, 4 }
 0x3da   :  { %v550_v10 = vadd.f32 %v549_v4, %v548_v6  ;;  %v424_v11 = vadd.f32 %v423_v9, %v422_v8 }
 0x3dc   :  { %v551_v12 = vrot.slane %v550_v10, 2  ;;  %v425_v13 = vrot.slane %v424_v11, 1 }
 0x3de   :  { %v426_v7 = vadd.f32 %v425_v13, %v424_v11  ;;  %v552_v14 = vadd.f32 %v551_v12, %v550_v10 }
 0x3e0   :  { %599 = vpush %v426_v7  ;;  %v553_v15 = vrot.slane %v552_v14, 1 }
 0x3e2   :  { %v554_v16 = vadd.f32 %v553_v15, %v552_v14 }
 0x3e4   :  { %601 = vpush %v554_v16 }
 0x411   :  { %s600_s1 = spop %599 }
 0x412   :  { %v428_v28 = vstv %s600_s1 }
 0x415   :  { %s602_s4 = spop %601 }
 0x416   :  { %v556_v25 = vstv %s602_s4 }
 0x460   :  { %v559_v5 = vpop.xlane.xlu0 %558 }
 0x461   :  { %v560_v17 = vrot.slane %v559_v5, 4 }
 0x463   :  { %v561_v18 = vadd.f32 %v560_v17, %v559_v5 }
 0x465   :  { %v562_v19 = vrot.slane %v561_v18, 2 }
 0x467   :  { %v563_v20 = vadd.f32 %v562_v19, %v561_v18 }
 0x469   :  { %v564_v21 = vrot.slane %v563_v20, 1 }
 0x46b   :  { %v565_v22 = vadd.f32 %v564_v21, %v563_v20 }
 0x46d   :  { %603 = vpush %v565_v22 }
 0x49e   :  { %s604_s5 = spop %603 }
 0x49f   :  { %v567_v26 = vstv %s604_s5 }
 0x4a0   :  { %v568_v27 = vadd.f32 %v567_v26, %v556_v25 }
 0x4a2   :  { %v569_v29 = vsub.f32 %v428_v28, %v568_v27 }
 0x4a4   :  { %v570_v30 = vmul.f32 0.125, %v569_v29 }
 0x4a6   :  { %572 = vst.msk [vmem:[#allocation10] sm:$0x1] %vm571_vm8, %v570_v30 }
 0x4a7   :  { %705 = shalt.err (!%p702_p6)
}
 0x4a8   :  { %s706_s12 = scalar_lea.hbm %s875_s2, 16 }
 0x4a9   :  { %p707_p7 = scmp.ne.s32.totalorder %s875_s2, %s706_s12  ;;  %p710_p8 = scmp.lt.u32.totalorder %s706_s12, %s875_s2 }
 0x4ab   :  { %p712_p9 = pnand %p710_p8, %p707_p7 }
 0x4ad   :  { %715 = shalt.err (!%p712_p9)
}
 0x4ae   :  { %582 = dma.vmem_to_hbm [thread:$0]  %s580_s7, 16, %s875_s2, [#allocation7]  }
 0x4af   :  { %720 = dma.done.wait [#allocation7], 16  }
 0x4b0   :  { %721 = vsyncadd [#allocation7], 4294967280 }
 0x4b1   :  { %586 = vsyncpa [#allocation6], 1 }
 0x4b2   :  { %587 = vsyncpa [#allocation9], 1 }
 0x4b3   :  { %588 = vsyncpa [#allocation7], 1 }

</bundles_post_ra>
